<compile_context>
chip_gen: v7x
topology: tpu7x:2x2x1
jax: 0.10.0
libtpu: 0.0.40
codegen_flags: <defaults>
</compile_context>

<pallas_src>
import functools

import jax
import jax.numpy as jnp
from jax import lax
from jax.experimental import pallas as pl
from jax.experimental.pallas import tpu as pltpu


def _attn_ctx_kernel(hidden_ref, enc_ref, wh_ref, we_ref, b_ref, v_ref,
                     attn_ref, ctx_ref,
                     hproj_ref, m_ref, l_ref, acc_ref,
                     *, tanh_in_bf16):
    """Grid = (batch, seq_tiles); the seq axis carries softmax + context.

    hidden_ref : (1, 1, 2H)  f32   decoder hidden state for this batch element
    enc_ref    : (1, TS, 2H) f32   encoder (lstm_out) tile, batch-major
    wh_ref     : (H, 2H)     f32   hidden half of the fused attn Linear
    we_ref     : (H, 2H)     bf16  encoder half of the fused attn Linear
    b_ref      : (H, 1)      f32   attn Linear bias (broadcast-ready)
    v_ref      : (H, 1)      f32   v projection weights (broadcast-ready)
    attn_ref   : (1, 1, S)   f32   resident block: raw scores, then softmax
    ctx_ref    : (1, 1, 2H)  f32   fused context output
    hproj_ref  : (H, 1)      f32   scratch: Wh @ hidden + b (once per batch)
    m_ref/l_ref: (1, 1)      f32   online-softmax running max / denominator
    acc_ref    : (1, 2H)     f32   unnormalized context accumulator
    """
    k = pl.program_id(1)
    nk = pl.num_programs(1)
    ts = enc_ref.shape[1]

    # ---- init (once per batch element): hidden projection + softmax state --
    @pl.when(k == 0)
    def _init():
        h = hidden_ref[0]                                          # (1, 2H) f32
        # VPU multiply + lane reduce; stored broadcast-ready as (H, 1).
        hproj_ref[...] = (jnp.sum(wh_ref[...] * h, axis=1, keepdims=True)
                          + b_ref[...])
        m_ref[...] = jnp.full((1, 1), -jnp.inf, jnp.float32)
        l_ref[...] = jnp.zeros((1, 1), jnp.float32)
        acc_ref[...] = jnp.zeros(acc_ref.shape, jnp.float32)

    enc_f32 = enc_ref[0]                                           # (TS, 2H) f32
    enc_bf16 = enc_f32.astype(jnp.bfloat16)                        # in-kernel cast

    # ---- encoder projection, seq on lanes: (H, 2H) . (TS, 2H)^T -> (H, TS) --
    e_proj = lax.dot_general(
        we_ref[...], enc_bf16,
        dimension_numbers=(((1,), (1,)), ((), ())),
        preferred_element_type=jnp.float32)                        # (H, TS)

    pre = e_proj + hproj_ref[...]                                  # (H,1) lane-bcast
    if tanh_in_bf16:
        # v6e/v7x: bf16 EUP has ~2x transcendental throughput.
        energy = jnp.tanh(pre.astype(jnp.bfloat16)).astype(jnp.float32)
    else:
        energy = jnp.tanh(pre)                                     # (H, TS) f32

    # ---- v projection: VPU multiply + sublane reduce -> lane-dense scores --
    scores = jnp.sum(energy * v_ref[...], axis=0, keepdims=True)   # (1, TS) f32

    # ---- online softmax + fused context accumulation (flash-style) ---------
    m_prev = m_ref[...]
    m_new = jnp.maximum(m_prev, jnp.max(scores, axis=1, keepdims=True))
    alpha = jnp.exp(m_prev - m_new)
    p = jnp.exp(scores - m_new)                                    # (1, TS)
    l_ref[...] = alpha * l_ref[...] + jnp.sum(p, axis=1, keepdims=True)
    acc_ref[...] = alpha * acc_ref[...] + jnp.dot(
        p, enc_f32, preferred_element_type=jnp.float32)            # (1, 2H)
    m_ref[...] = m_new

    # ---- stash raw scores in the resident seq-last output block ------------
    start = k * ts
    if ts % 128 == 0:
        start = pl.multiple_of(start, 128)
    attn_ref[:, :, pl.ds(start, ts)] = scores.reshape(1, 1, ts)

    # ---- finalize: exact-divide softmax + normalized context ---------------
    @pl.when(k == nk - 1)
    def _finalize():
        inv_l = 1.0 / l_ref[...]
        s_raw = attn_ref[0]                                        # (1, S)
        attn_ref[0] = jnp.exp(s_raw - m_ref[...]) * inv_l
        ctx_ref[0] = (acc_ref[...] * inv_l).astype(ctx_ref.dtype)


def prepare_attention_params(w_attn, b_attn, w_v):
    """One-time parameter prep: split the fused Linear weight by the
    torch.cat((hidden, encoder_outputs)) order.  The encoder half feeds the
    MXU as bf16; the hidden half stays f32 (VPU-only); bias / v are stored in
    broadcast-ready (H, 1) shape."""
    H = w_attn.shape[0]
    wh = jnp.asarray(w_attn[:, :2 * H], dtype=jnp.float32)      # (H, 2H)
    we = jnp.asarray(w_attn[:, 2 * H:], dtype=jnp.bfloat16)     # (H, 2H)
    b = jnp.asarray(b_attn, jnp.float32).reshape(H, 1)          # (H, 1)
    v = jnp.asarray(w_v, jnp.float32).reshape(H, 1)             # (H, 1)
    return wh, we, b, v


def _choose_seq_tile(S, twoH, bytes_per_elem=4, budget_bytes=6 * 1024 * 1024):
    """Largest seq tile (lane axis) dividing S whose f32 encoder block fits the
    per-buffer budget.  Prefer multiples of 128 (lane-dense); fall back to
    multiples of 8, then to the full sequence.  The 6 MiB default keeps the
    double-buffered encoder well inside v7x's 64 MiB VMEM; raise it on
    v5e/v6e (128 MiB) for very long sequences."""
    def fits(ts):
        return ts * twoH * bytes_per_elem <= budget_bytes
    for step in (128, 8):
        cands = [ts for ts in range(step, S + 1, step)
                 if S % ts == 0 and fits(ts)]
        if cands:
            return max(cands)
    return S


@functools.partial(jax.jit, static_argnames=("tile_s", "tanh_in_bf16"))
def attention_context_pallas(hidden, lstm_out, wh, we, b, v,
                             tile_s=None, tanh_in_bf16=False):
    """hidden: (B, 2H) f32; lstm_out: (B, S, 2H) f32 batch-major (exactly as
    produced by the parent CpGPredictor).  Returns
      attn    : (B, 1, S)  softmax attention weights (parent's unsqueeze(1) shape)
      context : (B, 1, 2H) fused bmm(attn, lstm_out)."""
    B, S, twoH = lstm_out.shape
    H = wh.shape[0]
    assert twoH == 2 * H
    assert hidden.shape == (B, twoH)
    assert we.shape == (H, twoH) and b.shape == (H, 1) and v.shape == (H, 1)

    ts = _choose_seq_tile(S, twoH) if tile_s is None else tile_s
    assert S % ts == 0 and (ts % 8 == 0 or ts == S), (S, ts)
    nk = S // ts

    hidden3 = hidden.reshape(B, 1, twoH)   # tiny layout plumbing (B*2H elems)

    cost = pl.CostEstimate(
        flops=B * (2 * S * twoH * H     # encoder projection (MXU)
                   + 2 * twoH * H       # hidden projection (VPU)
                   + 2 * S * H          # v projection
                   + 2 * S * twoH       # fused context reduction
                   + 8 * S),            # softmax bookkeeping
        transcendentals=B * (S * H + 2 * S),
        bytes_accessed=(B * S * twoH * 4      # encoder read (f32, once)
                        + B * twoH * 4        # hidden
                        + H * twoH * (4 + 2)  # Wh f32 + We bf16
                        + 2 * H * 4           # bias, v
                        + B * S * 4           # attn out
                        + B * twoH * 4),      # context out
    )

    grid_spec = pltpu.PrefetchScalarGridSpec(
        num_scalar_prefetch=0,
        grid=(B, nk),
        in_specs=[
            pl.BlockSpec((1, 1, twoH), lambda i, k: (i, 0, 0)),    # hidden
            pl.BlockSpec((1, ts, twoH), lambda i, k: (i, k, 0)),   # encoder tile
            pl.BlockSpec((H, twoH), lambda i, k: (0, 0)),          # Wh (f32)
            pl.BlockSpec((H, twoH), lambda i, k: (0, 0)),          # We (bf16)
            pl.BlockSpec((H, 1), lambda i, k: (0, 0)),             # bias
            pl.BlockSpec((H, 1), lambda i, k: (0, 0)),             # v
        ],
        out_specs=(
            pl.BlockSpec((1, 1, S), lambda i, k: (i, 0, 0)),       # attn (resident)
            pl.BlockSpec((1, 1, twoH), lambda i, k: (i, 0, 0)),    # context
        ),
        scratch_shapes=[
            pltpu.VMEM((H, 1), jnp.float32),      # hproj
            pltpu.VMEM((1, 1), jnp.float32),      # running max
            pltpu.VMEM((1, 1), jnp.float32),      # running denom
            pltpu.VMEM((1, twoH), jnp.float32),   # unnormalized context
        ],
    )

    attn, ctx = pl.pallas_call(
        functools.partial(_attn_ctx_kernel, tanh_in_bf16=tanh_in_bf16),
        out_shape=(jax.ShapeDtypeStruct((B, 1, S), jnp.float32),
                   jax.ShapeDtypeStruct((B, 1, twoH), jnp.float32)),
        grid_spec=grid_spec,
        compiler_params=pltpu.CompilerParams(
            # Batch axis has >=2 tiles so v7x's second TensorCore gets work
            # (no-op on v5e/v6e); the seq axis carries softmax + context.
            dimension_semantics=("parallel", "arbitrary"),
            vmem_limit_bytes=32 * 1024 * 1024,
        ),
        cost_estimate=cost,
    )(hidden3, lstm_out, wh, we, b, v)

    return attn, ctx


def attention_reference(hidden, enc_sbd, w_attn, b_attn, w_v):
    """Pure-JAX f32 reference matching the PyTorch Attention.forward exactly
    (encoder in the module's (S, B, 2H) layout; softmax over the seq axis)."""
    S = enc_sbd.shape[0]
    h_rep = jnp.broadcast_to(hidden[None, :, :], (S,) + hidden.shape)
    x = jnp.concatenate([h_rep, enc_sbd], axis=2)            # (S, B, 4H)
    energy = jnp.tanh(x @ w_attn.T + b_attn)                 # (S, B, H)
    attention = (energy @ w_v.T)[..., 0]                     # (S, B)
    return jax.nn.softmax(attention, axis=0)


if __name__ == "__main__":
    hidden_dim = 32     # H (model uses 256; kept small for the demo)
    batch = 2
    seq_len = 256

    key = jax.random.PRNGKey(0)
    k1, k2, k3, k4, k5 = jax.random.split(key, 5)

    # Parent-model layouts: hidden (B, 2H), lstm_out (B, S, 2H) batch-major.
    hidden = jax.random.normal(k1, (batch, 2 * hidden_dim), dtype=jnp.float32)
    lstm_out = jax.random.normal(
        k2, (batch, seq_len, 2 * hidden_dim), dtype=jnp.float32)

    # Deterministic nn.Linear-like parameter init.
    fan_in_attn = 4 * hidden_dim
    bound_attn = 1.0 / (fan_in_attn ** 0.5)
    w_attn = jax.random.uniform(
        k3, (hidden_dim, 4 * hidden_dim), jnp.float32, -bound_attn, bound_attn)
    b_attn = jax.random.uniform(
        k4, (hidden_dim,), jnp.float32, -bound_attn, bound_attn)
    bound_v = 1.0 / (hidden_dim ** 0.5)
    w_v = jax.random.uniform(
        k5, (1, hidden_dim), jnp.float32, -bound_v, bound_v)

    wh, we, b, v = prepare_attention_params(w_attn, b_attn, w_v)

    # f32 reference: attention weights (S, B) and context (B, 2H).
    enc_sbd = jnp.transpose(lstm_out, (1, 0, 2))
    attn_ref_sb = attention_reference(hidden, enc_sbd, w_attn, b_attn, w_v)
    ctx_ref = jnp.einsum("sb,bsh->bh", attn_ref_sb, lstm_out)

    variants = [
        # auto tile (nk=1), f32 tanh
        dict(tile_s=None, tanh_in_bf16=False, atol_a=5e-3, atol_c=1e-2),
        # two seq tiles (nk=2) -> exercises online-softmax / fused-context path
        dict(tile_s=128, tanh_in_bf16=False, atol_a=5e-3, atol_c=1e-2),
        # bf16 tanh option (v6e/v7x EUP), slightly looser tolerance
        dict(tile_s=128, tanh_in_bf16=True, atol_a=2e-2, atol_c=3e-2),
    ]

    for cfg in variants:
        attn_p, ctx_p = jax.block_until_ready(
            attention_context_pallas(hidden, lstm_out, wh, we, b, v,
                                     tile_s=cfg["tile_s"],
                                     tanh_in_bf16=cfg["tanh_in_bf16"]))
        assert attn_p.shape == (batch, 1, seq_len)
        assert ctx_p.shape == (batch, 1, 2 * hidden_dim)
        # Softmax over the sequence axis must sum to 1.
        assert jnp.allclose(attn_p.sum(axis=-1), 1.0, atol=1e-3)
        err_a = float(jnp.max(jnp.abs(attn_p[:, 0, :] - attn_ref_sb.T)))
        assert jnp.allclose(attn_p[:, 0, :], attn_ref_sb.T,
                            atol=cfg["atol_a"], rtol=5e-2), err_a
        err_c = float(jnp.max(jnp.abs(ctx_p[:, 0, :] - ctx_ref)))
        assert jnp.allclose(ctx_p[:, 0, :], ctx_ref,
                            atol=cfg["atol_c"], rtol=5e-2), err_c

    print("KERNEL_OK")
</pallas_src>

<mosaic_0001>
module attributes {stable_mosaic.version = 11 : i64} {
  func.func @_attn_ctx_kernel(%arg0: i32, %arg1: i32, %arg2: memref<1x1x64xf32, #tpu.memory_space<vmem>>, %arg3: memref<1x256x64xf32, #tpu.memory_space<vmem>>, %arg4: memref<32x64xf32, #tpu.memory_space<vmem>>, %arg5: memref<32x64xbf16, #tpu.memory_space<vmem>>, %arg6: memref<32x1xf32, #tpu.memory_space<vmem>>, %arg7: memref<32x1xf32, #tpu.memory_space<vmem>>, %arg8: memref<1x1x256xf32, #tpu.memory_space<vmem>>, %arg9: memref<1x1x64xf32, #tpu.memory_space<vmem>>, %arg10: memref<32x1xf32, #tpu.memory_space<vmem>>, %arg11: memref<1x1xf32, #tpu.memory_space<vmem>>, %arg12: memref<1x1xf32, #tpu.memory_space<vmem>>, %arg13: memref<1x64xf32, #tpu.memory_space<vmem>>) attributes {dimension_semantics = [#tpu.dimension_semantics<parallel>, #tpu.dimension_semantics<arbitrary>], iteration_bounds = array<i64: 2, 1>, scalar_prefetch = 0 : i64, scratch_operands = 4 : i64, tpu.core_type = #tpu.core_type<tc>, window_params = [{transform_indices = @transform_0, window_bounds = array<i64: 1, 1, 64>}, {transform_indices = @transform_1, window_bounds = array<i64: 1, 256, 64>}, {pipeline_mode = #tpu.pipeline_mode<synchronous>, transform_indices = @transform_2, window_bounds = array<i64: 32, 64>}, {pipeline_mode = #tpu.pipeline_mode<synchronous>, transform_indices = @transform_3, window_bounds = array<i64: 32, 64>}, {pipeline_mode = #tpu.pipeline_mode<synchronous>, transform_indices = @transform_4, window_bounds = array<i64: 32, 1>}, {pipeline_mode = #tpu.pipeline_mode<synchronous>, transform_indices = @transform_5, window_bounds = array<i64: 32, 1>}, {transform_indices = @transform_6, window_bounds = array<i64: 1, 1, 256>}, {transform_indices = @transform_7, window_bounds = array<i64: 1, 1, 64>}]} {
    %c0_i32 = arith.constant 0 : i32
    %0 = arith.cmpi eq, %arg1, %c0_i32 : i32
    %1 = arith.extui %0 : i1 to i32
    %c0_i32_0 = arith.constant 0 : i32
    %2 = arith.cmpi ne, %1, %c0_i32_0 : i32
    scf.if %2 {
      %c0_29 = arith.constant 0 : index
      %c0_30 = arith.constant 0 : index
      %c0_31 = arith.constant 0 : index
      %47 = vector.load %arg2[%c0_29, %c0_30, %c0_31] : memref<1x1x64xf32, #tpu.memory_space<vmem>>, vector<1x1x64xf32>
      %48 = vector.shape_cast %47 : vector<1x1x64xf32> to vector<1x64xf32>
      %c0_32 = arith.constant 0 : index
      %c0_33 = arith.constant 0 : index
      %49 = vector.load %arg4[%c0_32, %c0_33] : memref<32x64xf32, #tpu.memory_space<vmem>>, vector<32x64xf32>
      %50 = vector.broadcast %48 : vector<1x64xf32> to vector<32x64xf32>
      %51 = arith.mulf %49, %50 : vector<32x64xf32>
      %cst_34 = arith.constant dense<0.000000e+00> : vector<32xf32>
      %52 = vector.multi_reduction <add>, %51, %cst_34 [1] : vector<32x64xf32> to vector<32xf32>
      %53 = vector.shape_cast %52 : vector<32xf32> to vector<32x1xf32>
      %c0_35 = arith.constant 0 : index
      %c0_36 = arith.constant 0 : index
      %54 = vector.load %arg6[%c0_35, %c0_36] : memref<32x1xf32, #tpu.memory_space<vmem>>, vector<32x1xf32>
      %55 = arith.addf %53, %54 : vector<32x1xf32>
      %c0_37 = arith.constant 0 : index
      %c0_38 = arith.constant 0 : index
      %56 = vector.load %arg10[%c0_37, %c0_38] : memref<32x1xf32, #tpu.memory_space<vmem>>, vector<32x1xf32>
      tpu.vector_store %arg10[%c0_37, %c0_38], %55 {strides = array<i32>} : memref<32x1xf32, #tpu.memory_space<vmem>>, vector<32x1xf32>,
      %cst_39 = arith.constant 0xFF800000 : f32
      %57 = vector.broadcast %cst_39 : f32 to vector<1x1xf32>
      %c0_40 = arith.constant 0 : index
      %c0_41 = arith.constant 0 : index
      %58 = vector.load %arg11[%c0_40, %c0_41] : memref<1x1xf32, #tpu.memory_space<vmem>>, vector<1x1xf32>
      tpu.vector_store %arg11[%c0_40, %c0_41], %57 {strides = array<i32>} : memref<1x1xf32, #tpu.memory_space<vmem>>, vector<1x1xf32>,
      %cst_42 = arith.constant 0.000000e+00 : f32
      %59 = vector.broadcast %cst_42 : f32 to vector<1x1xf32>
      %c0_43 = arith.constant 0 : index
      %c0_44 = arith.constant 0 : index
      %60 = vector.load %arg12[%c0_43, %c0_44] : memref<1x1xf32, #tpu.memory_space<vmem>>, vector<1x1xf32>
      tpu.vector_store %arg12[%c0_43, %c0_44], %59 {strides = array<i32>} : memref<1x1xf32, #tpu.memory_space<vmem>>, vector<1x1xf32>,
      %cst_45 = arith.constant 0.000000e+00 : f32
      %61 = vector.broadcast %cst_45 : f32 to vector<1x64xf32>
      %c0_46 = arith.constant 0 : index
      %c0_47 = arith.constant 0 : index
      %62 = vector.load %arg13[%c0_46, %c0_47] : memref<1x64xf32, #tpu.memory_space<vmem>>, vector<1x64xf32>
      tpu.vector_store %arg13[%c0_46, %c0_47], %61 {strides = array<i32>} : memref<1x64xf32, #tpu.memory_space<vmem>>, vector<1x64xf32>,
    } else {
    }
    %c0 = arith.constant 0 : index
    %c0_1 = arith.constant 0 : index
    %c0_2 = arith.constant 0 : index
    %3 = vector.load %arg3[%c0, %c0_1, %c0_2] : memref<1x256x64xf32, #tpu.memory_space<vmem>>, vector<1x256x64xf32>
    %4 = vector.shape_cast %3 : vector<1x256x64xf32> to vector<256x64xf32>
    %5 = arith.truncf %4 : vector<256x64xf32> to vector<256x64xbf16>
    %c0_3 = arith.constant 0 : index
    %c0_4 = arith.constant 0 : index
    %6 = vector.load %arg5[%c0_3, %c0_4] : memref<32x64xbf16, #tpu.memory_space<vmem>>, vector<32x64xbf16>
    %cst = arith.constant dense<0.000000e+00> : vector<32x256xf32>
    %7 = tpu.matmul %6, %5, %cst {dimension_numbers = #tpu.dot_dimension_numbers<[1], [1], [0], [0], [0, 0, 1, 0], [], []>} : vector<32x64xbf16>, vector<256x64xbf16>, vector<32x256xf32> -> vector<32x256xf32>
    %c0_5 = arith.constant 0 : index
    %c0_6 = arith.constant 0 : index
    %8 = vector.load %arg10[%c0_5, %c0_6] : memref<32x1xf32, #tpu.memory_space<vmem>>, vector<32x1xf32>
    %9 = vector.broadcast %8 : vector<32x1xf32> to vector<32x256xf32>
    %10 = arith.addf %7, %9 : vector<32x256xf32>
    %11 = math.tanh %10 : vector<32x256xf32>
    %c0_7 = arith.constant 0 : index
    %c0_8 = arith.constant 0 : index
    %12 = vector.load %arg7[%c0_7, %c0_8] : memref<32x1xf32, #tpu.memory_space<vmem>>, vector<32x1xf32>
    %13 = vector.broadcast %12 : vector<32x1xf32> to vector<32x256xf32>
    %14 = arith.mulf %11, %13 : vector<32x256xf32>
    %cst_9 = arith.constant dense<0.000000e+00> : vector<256xf32>
    %15 = vector.multi_reduction <add>, %14, %cst_9 [0] : vector<32x256xf32> to vector<256xf32>
    %16 = vector.shape_cast %15 : vector<256xf32> to vector<1x256xf32>
    %c0_10 = arith.constant 0 : index
    %c0_11 = arith.constant 0 : index
    %17 = vector.load %arg11[%c0_10, %c0_11] : memref<1x1xf32, #tpu.memory_space<vmem>>, vector<1x1xf32>
    %cst_12 = arith.constant dense<0xFF800000> : vector<1xf32>
    %18 = vector.multi_reduction <maximumf>, %16, %cst_12 [1] : vector<1x256xf32> to vector<1xf32>
    %19 = vector.shape_cast %18 : vector<1xf32> to vector<1x1xf32>
    %20 = arith.maximumf %17, %19 : vector<1x1xf32>
    %21 = arith.subf %17, %20 : vector<1x1xf32>
    %22 = math.exp %21 : vector<1x1xf32>
    %23 = vector.broadcast %20 : vector<1x1xf32> to vector<1x256xf32>
    %24 = arith.subf %16, %23 : vector<1x256xf32>
    %25 = math.exp %24 : vector<1x256xf32>
    %c0_13 = arith.constant 0 : index
    %c0_14 = arith.constant 0 : index
    %26 = vector.load %arg12[%c0_13, %c0_14] : memref<1x1xf32, #tpu.memory_space<vmem>>, vector<1x1xf32>
    %27 = arith.mulf %22, %26 : vector<1x1xf32>
    %cst_15 = arith.constant dense<0.000000e+00> : vector<1xf32>
    %28 = vector.multi_reduction <add>, %25, %cst_15 [1] : vector<1x256xf32> to vector<1xf32>
    %29 = vector.shape_cast %28 : vector<1xf32> to vector<1x1xf32>
    %30 = arith.addf %27, %29 : vector<1x1xf32>
    %c0_16 = arith.constant 0 : index
    %c0_17 = arith.constant 0 : index
    %31 = vector.load %arg12[%c0_16, %c0_17] : memref<1x1xf32, #tpu.memory_space<vmem>>, vector<1x1xf32>
    tpu.vector_store %arg12[%c0_16, %c0_17], %30 {strides = array<i32>} : memref<1x1xf32, #tpu.memory_space<vmem>>, vector<1x1xf32>,
    %c0_18 = arith.constant 0 : index
    %c0_19 = arith.constant 0 : index
    %32 = vector.load %arg13[%c0_18, %c0_19] : memref<1x64xf32, #tpu.memory_space<vmem>>, vector<1x64xf32>
    %33 = vector.broadcast %22 : vector<1x1xf32> to vector<1x64xf32>
    %34 = arith.mulf %33, %32 : vector<1x64xf32>
    %cst_20 = arith.constant dense<0.000000e+00> : vector<1x64xf32>
    %35 = tpu.matmul %25, %4, %cst_20 {dimension_numbers = #tpu.dot_dimension_numbers<[1], [0], [0], [1], [0, 0, 1, 1], [], []>} : vector<1x256xf32>, vector<256x64xf32>, vector<1x64xf32> -> vector<1x64xf32>
    %36 = arith.addf %34, %35 : vector<1x64xf32>
    %c0_21 = arith.constant 0 : index
    %c0_22 = arith.constant 0 : index
    %37 = vector.load %arg13[%c0_21, %c0_22] : memref<1x64xf32, #tpu.memory_space<vmem>>, vector<1x64xf32>
    tpu.vector_store %arg13[%c0_21, %c0_22], %36 {strides = array<i32>} : memref<1x64xf32, #tpu.memory_space<vmem>>, vector<1x64xf32>,
    %c0_23 = arith.constant 0 : index
    %c0_24 = arith.constant 0 : index
    %38 = vector.load %arg11[%c0_23, %c0_24] : memref<1x1xf32, #tpu.memory_space<vmem>>, vector<1x1xf32>
    tpu.vector_store %arg11[%c0_23, %c0_24], %20 {strides = array<i32>} : memref<1x1xf32, #tpu.memory_space<vmem>>, vector<1x1xf32>,
    %c256_i32 = arith.constant 256 : i32
    %39 = arith.muli %arg1, %c256_i32 : i32
    %40 = tpu.assume_multiple %39, 128 : i32
    %41 = vector.shape_cast %16 : vector<1x256xf32> to vector<1x1x256xf32>
    %c0_25 = arith.constant 0 : index
    %c0_26 = arith.constant 0 : index
    %42 = arith.index_cast %40 : i32 to index
    %43 = vector.load %arg8[%c0_25, %c0_26, %42] : memref<1x1x256xf32, #tpu.memory_space<vmem>>, vector<1x1x256xf32>
    tpu.vector_store %arg8[%c0_25, %c0_26, %42], %41 {strides = array<i32>} : memref<1x1x256xf32, #tpu.memory_space<vmem>>, vector<1x1x256xf32>,
    %c0_i32_27 = arith.constant 0 : i32
    %44 = arith.cmpi eq, %arg1, %c0_i32_27 : i32
    %45 = arith.extui %44 : i1 to i32
    %c0_i32_28 = arith.constant 0 : i32
    %46 = arith.cmpi ne, %45, %c0_i32_28 : i32
    scf.if %46 {
      %c0_29 = arith.constant 0 : index
      %c0_30 = arith.constant 0 : index
      %47 = vector.load %arg12[%c0_29, %c0_30] : memref<1x1xf32, #tpu.memory_space<vmem>>, vector<1x1xf32>
      %cst_31 = arith.constant 1.000000e+00 : f32
      %48 = vector.broadcast %cst_31 : f32 to vector<1x1xf32>
      %49 = arith.divf %48, %47 : vector<1x1xf32>
      %c0_32 = arith.constant 0 : index
      %c0_33 = arith.constant 0 : index
      %c0_34 = arith.constant 0 : index
      %50 = vector.load %arg8[%c0_32, %c0_33, %c0_34] : memref<1x1x256xf32, #tpu.memory_space<vmem>>, vector<1x1x256xf32>
      %51 = vector.shape_cast %50 : vector<1x1x256xf32> to vector<1x256xf32>
      %c0_35 = arith.constant 0 : index
      %c0_36 = arith.constant 0 : index
      %52 = vector.load %arg11[%c0_35, %c0_36] : memref<1x1xf32, #tpu.memory_space<vmem>>, vector<1x1xf32>
      %53 = vector.broadcast %52 : vector<1x1xf32> to vector<1x256xf32>
      %54 = arith.subf %51, %53 : vector<1x256xf32>
      %55 = math.exp %54 : vector<1x256xf32>
      %56 = vector.broadcast %49 : vector<1x1xf32> to vector<1x256xf32>
      %57 = arith.mulf %55, %56 : vector<1x256xf32>
      %c0_37 = arith.constant 0 : index
      %c0_38 = arith.constant 0 : index
      %c0_39 = arith.constant 0 : index
      %58 = vector.load %arg8[%c0_37, %c0_38, %c0_39] : memref<1x1x256xf32, #tpu.memory_space<vmem>>, vector<1x1x256xf32>
      %59 = vector.shape_cast %58 : vector<1x1x256xf32> to vector<1x256xf32>
      %60 = vector.shape_cast %57 : vector<1x256xf32> to vector<1x1x256xf32>
      tpu.vector_store %arg8[%c0_37, %c0_38, %c0_39], %60 {strides = array<i32>} : memref<1x1x256xf32, #tpu.memory_space<vmem>>, vector<1x1x256xf32>,
      %c0_40 = arith.constant 0 : index
      %c0_41 = arith.constant 0 : index
      %61 = vector.load %arg13[%c0_40, %c0_41] : memref<1x64xf32, #tpu.memory_space<vmem>>, vector<1x64xf32>
      %62 = vector.broadcast %49 : vector<1x1xf32> to vector<1x64xf32>
      %63 = arith.mulf %61, %62 : vector<1x64xf32>
      %c0_42 = arith.constant 0 : index
      %c0_43 = arith.constant 0 : index
      %c0_44 = arith.constant 0 : index
      %64 = vector.load %arg9[%c0_42, %c0_43, %c0_44] : memref<1x1x64xf32, #tpu.memory_space<vmem>>, vector<1x1x64xf32>
      %65 = vector.shape_cast %64 : vector<1x1x64xf32> to vector<1x64xf32>
      %66 = vector.shape_cast %63 : vector<1x64xf32> to vector<1x1x64xf32>
      tpu.vector_store %arg9[%c0_42, %c0_43, %c0_44], %66 {strides = array<i32>} : memref<1x1x64xf32, #tpu.memory_space<vmem>>, vector<1x1x64xf32>,
    } else {
    }
    return
  }
  func.func @transform_0(%arg0: i32, %arg1: i32) -> (i32, i32, i32) {
    %c0_i32 = arith.constant 0 : i32
    %c0_i32_0 = arith.constant 0 : i32
    %c0_i32_1 = arith.constant 0 : i32
    return %arg0, %c0_i32, %c0_i32_0 : i32, i32, i32
  }
  func.func @transform_1(%arg0: i32, %arg1: i32) -> (i32, i32, i32) {
    %c0_i32 = arith.constant 0 : i32
    %c0_i32_0 = arith.constant 0 : i32
    return %arg0, %arg1, %c0_i32 : i32, i32, i32
  }
  func.func @transform_2(%arg0: i32, %arg1: i32) -> (i32, i32) {
    %c0_i32 = arith.constant 0 : i32
    %c0_i32_0 = arith.constant 0 : i32
    %c0_i32_1 = arith.constant 0 : i32
    return %c0_i32, %c0_i32_0 : i32, i32
  }
  func.func @transform_3(%arg0: i32, %arg1: i32) -> (i32, i32) {
    %c0_i32 = arith.constant 0 : i32
    %c0_i32_0 = arith.constant 0 : i32
    %c0_i32_1 = arith.constant 0 : i32
    return %c0_i32, %c0_i32_0 : i32, i32
  }
  func.func @transform_4(%arg0: i32, %arg1: i32) -> (i32, i32) {
    %c0_i32 = arith.constant 0 : i32
    %c0_i32_0 = arith.constant 0 : i32
    %c0_i32_1 = arith.constant 0 : i32
    return %c0_i32, %c0_i32_0 : i32, i32
  }
  func.func @transform_5(%arg0: i32, %arg1: i32) -> (i32, i32) {
    %c0_i32 = arith.constant 0 : i32
    %c0_i32_0 = arith.constant 0 : i32
    %c0_i32_1 = arith.constant 0 : i32
    return %c0_i32, %c0_i32_0 : i32, i32
  }
  func.func @transform_6(%arg0: i32, %arg1: i32) -> (i32, i32, i32) {
    %c0_i32 = arith.constant 0 : i32
    %c0_i32_0 = arith.constant 0 : i32
    %c0_i32_1 = arith.constant 0 : i32
    return %arg0, %c0_i32, %c0_i32_0 : i32, i32, i32
  }
  func.func @transform_7(%arg0: i32, %arg1: i32) -> (i32, i32, i32) {
    %c0_i32 = arith.constant 0 : i32
    %c0_i32_0 = arith.constant 0 : i32
    %c0_i32_1 = arith.constant 0 : i32
    return %arg0, %c0_i32, %c0_i32_0 : i32, i32, i32
  }
}

</mosaic_0001>

<bundles_post_ra>
// kernel: attention_context_pallas.1
= control target key start
LH: loop header
LB: loop body
LE: loop exit
PB: predicated region body
PF: predicated region fallthrough
CT: control target
= control target key end

     0   :  { %13 = vsyncpa [#allocation7], 0  ;;  %s1595_s0 = inlined_call_operand.vmem [shape: f32[2,1,64], index: 0, kind: input, shape index: {}]   ;;  %s1596_s1 = inlined_call_operand.vmem [shape: f32[2,256,64], index: 1, kind: input, shape index: {}]   ;;  %s1597_s2 = inlined_call_operand.vmem [shape: f32[32,64], index: 2, kind: input, shape index: {}]   ;;  %s1598_s3 = inlined_call_operand.vmem [shape: bf16[32,64], index: 3, kind: input, shape index: {}]   ;;  %s1599_s4 = inlined_call_operand.vmem [shape: f32[32,1], index: 4, kind: input, shape index: {}]   ;;  %s1600_s5 = inlined_call_operand.vmem [shape: f32[32,1], index: 5, kind: input, shape index: {}]   ;;  %s1601_s6 = inlined_call_operand.hbm [shape: f32[2,1,256], index: 6, kind: output, shape index: {0}]   ;;  %s1602_s7 = inlined_call_operand.hbm [shape: f32[2,1,64], index: 7, kind: output, shape index: {1}]  }
   0x1   :  { %15 = vsyncpa [#allocation7 + $0x1], 0 }
   0x2   :  { %16 = vsyncpa [#allocation9], 0 }
   0x3   :  { %18 = vsyncpa [#allocation9 + $0x1], 0  ;;  %s1320_s24 = smov 0   ;;  %s1322_s25 = smov 0  }
   0x4   :  { %s1324_s26 = smov 0   ;;  %s1326_s27 = smov 0  }
   0x5   :  { %s1328_s28 = smov 0   ;;  %s1330_s29 = smov 0  }
   0x6 LB: > { %s952_s30 = sadd.s32 4294967295, %s1272_s29   ;;  %s953_s8 = sadd.s32 4294967294, %s1272_s29   ;;  %s1272_s29 = sphi %s1330_s29, %s24_s29   ;;  %s1268_s28 = sphi %s1328_s28, %s1611_s28   ;;  %s1264_s27 = sphi %s1326_s27, %s1610_s27   ;;  %s1260_s26 = sphi %s1324_s26, %s1609_s26   ;;  %s1256_s25 = sphi %s1322_s25, %s1608_s25   ;;  %s1252_s24 = sphi %s1320_s24, %s1607_s24  }
   0x7   : > { %s36_s9 = sadd.s32 1, %s1268_s28  ;;  %s181_s10 = sadd.s32 1, %s1260_s26 }
   0x8   : > { %p38_p0 = scmp.ge.s32.totalorder %s36_s9, 2  ;;  %p191_p1 = scmp.ne.s32.totalorder %s1260_s26, %s1256_s25 }
   0x9   : > { %p192_p2 = scmp.eq.s32.totalorder %s952_s30, 1  ;;  %p197_p3 = scmp.ne.s32.totalorder %s1256_s25, %s1252_s24 }
   0xa   : > { %s1613_s9 = smov (%p38_p0, %s36_s9), 0  ;;  %p198_p5 = scmp.eq.s32.totalorder %s953_s8, 1 }
   0xb   : > { %p1360_p4 = por %p192_p2, %p191_p1  ;;  %s178_s12 = ssub.s32 %s1268_s28, %s1613_s9 }
   0xc   : > { %p956_p6 = scmp.ge.s32.totalorder %s1272_s29, 1  ;;  %p179_p7 = scmp.eq.s32.totalorder %s178_s12, 0 }
   0xd   : > { %p1367_p8 = por %p198_p5, %p197_p3  ;;  %p273_p9 = scmp.lt.s32.totalorder %s1272_s29, 3 }
   0xe   : > { %s1373_s14 = scalar_select %p179_p7, %s1260_s26, %s181_s10  }
   0xf   : > { %p274_p10 = pnand %p956_p6, %p273_p9 }
  0x10   : > { %p316_p11 = scmp.lt.s32.totalorder (!%p274_p10), %s1264_s27, 1  ;;  %v1380_v0 = vld [vmem:[%s1598_s3] sm:$0xff] (!%p274_p10)   ;;  %vm349_vm0 = vcmask (!%p274_p10), 523264   ;;  %v336_v2 = vld [vmem:[%s1597_s2 + $0x8] sm:$0xff] (!%p274_p10)  ;;  %v337_v3 = vld [vmem:[%s1597_s2 + $0x10] sm:$0xff] (!%p274_p10)  ;;  %v1274_v58 = vmov (!%p274_p10), 0  }
  0x11   : > { %277 = sbr.rel (%p274_p10) target bundleno = 982 (0x3d6), region = 44  ;;  %v335_v1 = vld [vmem:[%s1597_s2] sm:$0xff] (!%p274_p10)  ;;  %v338_v4 = vld [vmem:[%s1597_s2 + $0x18] sm:$0xff] (!%p274_p10)  ;;  %989 = vmatprep.mubr.msk.bf16.mxu0 (!%p274_p10), %vm349_vm0, %v1380_v0  ;;  %1132 = vset.pattern.permute.xlu0 (!%p274_p10), %v1274_v58  ;;  %vm370_vm1 = vcmask (!%p274_p10), 7168   ;;  %vm375_vm2 = vcmask (!%p274_p10), 0   ;;  %s1489_s8 = sand.u32 (!%p274_p10), 1, %s1256_s25  }
  0x12   : > { %1133 = vset.pattern.permute.xlu1 (!%p274_p10), %v1274_v58  ;;  %vm378_vm4 = vcmask (!%p274_p10), 516096   ;;  %s972_s16 = sshll.u32 (!%p274_p10), %s1264_s27, 5  ;;  %s968_s18 = sshll.u32 (!%p274_p10), %s1264_s27, 4 }
  0x13   : > { %s315_s19 = scalar_lea.vmem (!%p274_p10), [#allocation8], %s1489_s8  ;;  %s1514_s22 = scalar_lea.hbm (!%p274_p10), %s1601_s6, %s972_s16 }
  0x18   : > { %s317_s15 = scalar_select %p316_p11, %s1264_s27, 1 }
  0x19   : > { %s1521_s27 = scalar_lea.hbm %s1602_s7, %s968_s18 }
  0x1a   : > { %s318_s10 = scalar_lea.vmem %s1595_s0, %s317_s15  ;;  %s971_s12 = sshll.u32 %s317_s15, 8 }
  0x1b   : > { %s1402_s20 = scalar_lea.vmem %s1596_s1, %s971_s12  ;;  %v960_v5 = vld [vmem:[%s318_s10] ss:$0 sm:$0xff]  ;;  %s957_s10 = sshll.u32 %s1489_s8, 1 }
  0x1c   : > { %v345_v6 = vmul.f32 %v960_v5, %v335_v1  ;;  %v396_v7 = vld [vmem:[%s1402_s20 + $0x80] sm:$0xff]  ;;  %v397_v8 = vld [vmem:[%s1402_s20 + $0x88] sm:$0xff]  ;;  %v346_v10 = vmul.f32 %v960_v5, %v336_v2  ;;  %v347_v11 = vmul.f32 %v960_v5, %v337_v3  ;;  %v398_v14 = vld [vmem:[%s1402_s20 + $0x90] sm:$0xff]  ;;  %v348_v16 = vmul.f32 %v960_v5, %v338_v4  ;;  %s1496_s12 = scalar_lea.vmem [#allocation6], %s957_s10  ;;  %s810_s10 = scalar_lea.sflag [#allocation7], %s1489_s8 }
  0x1d   : > { %v380_v9 = vld [vmem:[%s1402_s20] sm:$0xff]  ;;  %v420_v12 = vpack.c.bf16 %v397_v8, %v396_v7  ;;  %v381_v13 = vld [vmem:[%s1402_s20 + $0x8] sm:$0xff]  ;;  %v399_v15 = vld [vmem:[%s1402_s20 + $0x98] sm:$0xff]  ;;  %s828_s17 = sshll.u32 %s1496_s12, 4  ;;  %s1278_s15 = smov [#allocation6]   ;;  %s1516_s17 = int_to_ptr.vmem [resolvable:$true] %s828_s17 }
  0x1e   : > { %v350_v17 = vsel %vm349_vm0, %v345_v6, 0.0  ;;  %v412_v18 = vpack.c.bf16 %v381_v13, %v380_v9  ;;  %v356_v19 = vsel %vm349_vm0, %v347_v11, 0.0  ;;  %v421_v20 = vpack.c.bf16 %v399_v15, %v398_v14  ;;  %v382_v21 = vld [vmem:[%s1402_s20 + $0x10] sm:$0xff]  ;;  %v383_v22 = vld [vmem:[%s1402_s20 + $0x18] sm:$0xff]  ;;  %v400_v26 = vld [vmem:[%s1402_s20 + $0xa0] sm:$0xff]  ;;  %s1162_s16 = scalar_lea.vmem %s1516_s17, 32 }
  0x1f   : > { %351 = vadd.xlane.f32.xlu0 %v350_v17  ;;  %1060 = vmatprep.subr.msk.bf16.mxu0 %vm349_vm0, %v420_v12  ;;  %v353_v24 = vsel %vm349_vm0, %v346_v10, 0.0  ;;  %v359_v25 = vsel %vm349_vm0, %v348_v16, 0.0  ;;  %v401_v27 = vld [vmem:[%s1402_s20 + $0xa8] sm:$0xff]  ;;  %v413_v28 = vpack.c.bf16 %v383_v22, %v382_v21  ;;  %v384_v30 = vld [vmem:[%s1402_s20 + $0x20] sm:$0xff]  ;;  %v402_v32 = vld [vmem:[%s1402_s20 + $0xb0] sm:$0xff]  ;;  %p1163_p12 = scmp.ne.s32.totalorder %s1516_s17, %s1162_s16  ;;  %s1166_s21 = sshll.u32 %s1278_s15, 4  ;;  %s1167_s21 = int_to_ptr.vmem [resolvable:$false] %s1166_s21 }
  0x20   : > { %v474_v23 = vsel %vm349_vm0, %v412_v18, 0  ;;  %357 = vadd.xlane.f32.xlu1 %v356_v19  ;;  %1029 = vmatprep.subr.bf16.mxu1 %v420_v12  ;;  %v422_v29 = vpack.c.bf16 %v401_v27, %v400_v26  ;;  %v385_v31 = vld [vmem:[%s1402_s20 + $0x28] sm:$0xff]  ;;  %v403_v33 = vld [vmem:[%s1402_s20 + $0xb8] sm:$0xff]  ;;  %v386_v37 = vld [vmem:[%s1402_s20 + $0x30] sm:$0xff]  ;;  %s1168_s23 = scalar_lea.vmem %s1167_s21, 64  ;;  %p1169_p1 = scmp.lt.s32.totalorder %s1516_s17, %s1167_s21 }
  0x21   : > { %974 = vmatpush3.bf16.xpose.msra.mxu0 %v474_v23  ;;  %1031 = vmatpush3.bf16.msra.mxu1 %v412_v18  ;;  %v477_v34 = vsel %vm349_vm0, %v413_v28, 0  ;;  %v414_v35 = vpack.c.bf16 %v385_v31, %v384_v30  ;;  %v423_v36 = vpack.c.bf16 %v403_v33, %v402_v32  ;;  %v387_v38 = vld [vmem:[%s1402_s20 + $0x38] sm:$0xff]  ;;  %v404_v39 = vld [vmem:[%s1402_s20 + $0xc0] sm:$0xff]  ;;  %v405_v40 = vld [vmem:[%s1402_s20 + $0xc8] sm:$0xff]  ;;  %p1164_p13 = pnand %p1163_p12, %p1360_p4  ;;  %p1170_p2 = scmp.lt.s32.totalorder %s1168_s23, %s1162_s16 }
  0x22   : > { %1061 = vmatprep.subr.msk.bf16.mxu0 %vm349_vm0, %v421_v20  ;;  %1033 = vmatprep.subr.bf16.mxu1 %v421_v20  ;;  %v415_v41 = vpack.c.bf16 %v387_v38, %v386_v37  ;;  %v424_v42 = vpack.c.bf16 %v405_v40, %v404_v39  ;;  %v388_v43 = vld [vmem:[%s1402_s20 + $0x40] sm:$0xff]  ;;  %v389_v44 = vld [vmem:[%s1402_s20 + $0x48] sm:$0xff]  ;;  %v406_v45 = vld [vmem:[%s1402_s20 + $0xd0] sm:$0xff] }
  0x23   : > { %354 = vadd.xlane.f32.xlu0 %v353_v24  ;;  %v407_v46 = vld [vmem:[%s1402_s20 + $0xd8] sm:$0xff]  ;;  %v480_v47 = vsel %vm349_vm0, %v414_v35, 0  ;;  %v416_v48 = vpack.c.bf16 %v389_v44, %v388_v43  ;;  %v390_v50 = vld [vmem:[%s1402_s20 + $0x50] sm:$0xff]  ;;  %v408_v52 = vld [vmem:[%s1402_s20 + $0xe0] sm:$0xff]  ;;  %p1165_p0 = pneg %p1164_p13  ;;  %p1171_p3 = por %p1170_p2, %p1169_p1 }
  0x24   : > { %360 = vadd.xlane.f32.xlu1 %v359_v25  ;;  %v425_v49 = vpack.c.bf16 %v407_v46, %v406_v45  ;;  %v391_v51 = vld [vmem:[%s1402_s20 + $0x58] sm:$0xff]  ;;  %v409_v53 = vld [vmem:[%s1402_s20 + $0xe8] sm:$0xff]  ;;  %v392_v56 = vld [vmem:[%s1402_s20 + $0x60] sm:$0xff]  ;;  %v483_v61 = vsel %vm349_vm0, %v415_v41, 0 }
  0x25   : > { %1035 = vmatpush3.bf16.msra.mxu1 %v413_v28  ;;  %v417_v54 = vpack.c.bf16 %v391_v51, %v390_v50  ;;  %v426_v55 = vpack.c.bf16 %v409_v53, %v408_v52  ;;  %v393_v57 = vld [vmem:[%s1402_s20 + $0x68] sm:$0xff]  ;;  %v410_v59 = vld [vmem:[%s1402_s20 + $0xf0] sm:$0xff]  ;;  %v411_v60 = vld [vmem:[%s1402_s20 + $0xf8] sm:$0xff]  ;;  %v486_v4 = vsel %vm349_vm0, %v416_v48, 0  ;;  %v1275_v28 = vmov -inf   ;;  %p1172_p5 = pnand %p1171_p3, %p1165_p0 }
  0x26   : > { %1037 = vmatprep.subr.bf16.mxu1 %v422_v29  ;;  %v418_v62 = vpack.c.bf16 %v393_v57, %v392_v56  ;;  %v427_v63 = vpack.c.bf16 %v411_v60, %v410_v59  ;;  %v394_v1 = vld [vmem:[%s1402_s20 + $0x70] sm:$0xff]  ;;  %v395_v2 = vld [vmem:[%s1402_s20 + $0x78] sm:$0xff]  ;;  %v1135_v8 = vld [vmem:[%s1598_s3 + $0x8] sm:$0xff]   ;;  %376 = vst.msk [vmem:[#allocation3] sm:$0x1] %vm375_vm2, %v1275_v28  ;;  %s841_s20 = sshll.u32 %s315_s19, 4  ;;  %s1523_s20 = int_to_ptr.vmem [resolvable:$true] %s841_s20 }
  0x27   : > { %v419_v3 = vpack.c.bf16 %v395_v2, %v394_v1  ;;  %v489_v5 = vsel %vm349_vm0, %v417_v54, 0  ;;  %v362_v9 = vld [vmem:[%s1599_s4] sm:$0xff]  ;;  %v364_v10 = vld [vmem:[%s1599_s4 + $0x10] sm:$0xff]  ;;  %v365_v15 = vld [vmem:[%s1599_s4 + $0x18] sm:$0xff] }
  0x28   : > { %v492_v6 = vsel %vm349_vm0, %v418_v62, 0  ;;  %v582_v24 = vld [vmem:[%s1600_s5] sm:$0xff]  ;;  %v583_v25 = vld [vmem:[%s1600_s5 + $0x8] sm:$0xff]  ;;  %v584_v26 = vld [vmem:[%s1600_s5 + $0x10] sm:$0xff] }
  0x29   : > { %976 = vmatpush3.bf16.xpose.msra.mxu0 %v477_v34  ;;  %1039 = vmatpush3.bf16.msra.mxu1 %v414_v35  ;;  %v495_v7 = vsel %vm349_vm0, %v419_v3, 0  ;;  %v585_v27 = vld [vmem:[%s1600_s5 + $0x18] sm:$0xff] }
  0x2a   : > { %1062 = vmatprep.subr.msk.bf16.mxu0 %vm349_vm0, %v422_v29  ;;  %1041 = vmatprep.subr.bf16.mxu1 %v423_v36 }
  0x2d   : > { %1043 = vmatpush3.bf16.msra.mxu1 %v415_v41 }
  0x2e   : > { %1045 = vmatprep.subr.bf16.mxu1 %v424_v42 }
  0x31   : > { %978 = vmatpush3.bf16.xpose.msra.mxu0 %v480_v47  ;;  %1047 = vmatpush3.bf16.msra.mxu1 %v416_v48 }
  0x32   : > { %1063 = vmatprep.subr.msk.bf16.mxu0 %vm349_vm0, %v423_v36  ;;  %1049 = vmatprep.subr.bf16.mxu1 %v425_v49 }
  0x35   : > { %1051 = vmatpush3.bf16.msra.mxu1 %v417_v54 }
  0x36   : > { %1053 = vmatprep.subr.bf16.mxu1 %v426_v55 }
  0x39   : > { %980 = vmatpush3.bf16.xpose.msra.mxu0 %v483_v61  ;;  %1055 = vmatpush3.bf16.msra.mxu1 %v418_v62 }
  0x3a   : > { %1064 = vmatprep.subr.msk.bf16.mxu0 %vm349_vm0, %v424_v42  ;;  %1057 = vmatprep.subr.bf16.mxu1 %v427_v63 }
  0x3d   : > { %1059 = vmatpush3.bf16.msra.mxu1 %v419_v3 }
  0x41   : > { %982 = vmatpush3.bf16.xpose.msra.mxu0 %v486_v4 }
  0x42   : > { %1065 = vmatprep.subr.msk.bf16.mxu0 %vm349_vm0, %v425_v49 }
  0x49   : > { %984 = vmatpush3.bf16.xpose.msra.mxu0 %v489_v5 }
  0x4a   : > { %1066 = vmatprep.subr.msk.bf16.mxu0 %vm349_vm0, %v426_v55 }
  0x51   : > { %986 = vmatpush3.bf16.xpose.msra.mxu0 %v492_v6 }
  0x52   : > { %1067 = vmatprep.subr.msk.bf16.mxu0 %vm349_vm0, %v427_v63 }
  0x59   : > { %988 = vmatpush3.bf16.xpose.msra.mxu0 %v495_v7 }
  0x60   : > { %990 = vmatmul.mubr.msk.bf16.vlgmr.msra.gmra.mrb[0].mxu0 %vm349_vm0, %v1380_v0  ;;  %v363_v0 = vld [vmem:[%s1599_s4 + $0x8] sm:$0xff] }
  0x61   : > { %991 = vmatprep.mubr.msk.bf16.mxu0 %vm349_vm0, %v1135_v8 }
  0x68   : > { %992 = vmatmul.mubr.msk.bf16.gmra.mrb[4].mxu0 %vm349_vm0, %v1135_v8 }
  0xac   : > { %v352_v11 = vpop.xlane.xlu0 %351 }
  0xad   : > { %v366_v12 = vadd.f32 %v362_v9, %v352_v11  ;;  %v358_v13 = vpop.xlane.xlu1 %357 }
  0xae   : > { %v368_v14 = vadd.f32 %v364_v10, %v358_v13 }
  0xaf   : > { %371 = vst.msk [vmem:[#allocation2] sm:$0xff] %vm370_vm1, %v366_v12 }
  0xb0   : > { %v355_v16 = vpop.xlane.xlu0 %354  ;;  %373 = vst.msk [vmem:[#allocation2 + $0x10] sm:$0xff] %vm370_vm1, %v368_v14 }
  0xb1   : > { %v367_v17 = vadd.f32 %v363_v0, %v355_v16  ;;  %v361_v18 = vpop.xlane.xlu1 %360  ;;  %v1276_v16 = vmov 1966171168  }
  0xb2   : > { %v369_v19 = vadd.f32 %v365_v15, %v361_v18  ;;  %v645_v15 = vlaneseq }
  0xb3   : > { %372 = vst.msk [vmem:[#allocation2 + $0x8] sm:$0xff] %vm370_vm1, %v367_v17  ;;  %v753_v17 = vunpack.c.l.s4 %v1276_v16 }
  0xb4   : > { %374 = vst.msk [vmem:[#allocation2 + $0x18] sm:$0xff] %vm370_vm1, %v369_v19  ;;  %vm1492_vm3 = vcmp.lt.s32.totalorder %v645_v15, 256 }
  0xb6   : > { %v432_v20 = vld [vmem:[#allocation2] sm:$0xff] }
  0xb7   : > { %438 = vperm.xlu0 %1132, %v432_v20   ;;  %v434_v22 = vld [vmem:[#allocation2 + $0x10] sm:$0xff] }
  0xba   : > { %v433_v21 = vld [vmem:[#allocation2 + $0x8] sm:$0xff] }
  0xbb   : > { %443 = vperm.xlu1 %1133, %v433_v21   ;;  %v435_v23 = vld [vmem:[#allocation2 + $0x18] sm:$0xff] }
  0xbf   : > { %448 = vperm.xlu1 %1133, %v434_v22   ;;  %v646_v22 = vshrl.u32 %v645_v15, 7 }
  0xc3   : > { %453 = vperm.xlu1 %1133, %v435_v23   ;;  %v754_v23 = vunpack.c.0.s8 %v753_v17 }
  0xc5   : > { %v757_v28 = vsub.s32 %v754_v23, %v646_v22 }
  0xc7   : > { %588 = vperm.xlu1 %1133, %v582_v24  }
  0xcb   : > { %593 = vperm.xlu1 %1133, %v583_v25  }
  0xcf   : > { %598 = vperm.xlu1 %1133, %v584_v26  }
  0xd3   : > { %603 = vperm.xlu1 %1133, %v585_v27  }
 0x133   : > { %v555_v29 = vpop.f32.mrb[0].mxu0 }
 0x134   : > { %v557_v30 = vpop.f32.mrb[1].mxu0 }
 0x135   : > { %v559_v31 = vpop.f32.mrb[2].mxu0 }
 0x136   : > { %v439_v32 = vpop.permute.xlu0 %438  ;;  %v561_v33 = vpop.f32.mrb[3].mxu0 }
 0x137   : > { %v556_v34 = vadd.f32 %v555_v29, %v439_v32  ;;  %v558_v35 = vadd.f32 %v557_v30, %v439_v32 }
 0x139   : > { %1136 = vtanh.f32 %v556_v34  ;;  %v1277_v34 = vmov 0.0  }
 0x13a   : > { %v444_v36 = vpop.permute.xlu1 %443  ;;  %1138 = vtanh.f32 %v558_v35  ;;  %377 = vst.msk [vmem:[#allocation4] sm:$0x1] %vm375_vm2, %v1277_v34  ;;  %v632_v35 = vld [vmem:[#allocation3] sm:$0x1] }
 0x13b   : > { %v560_v37 = vadd.f32 %v559_v31, %v444_v36  ;;  %v565_v38 = vpop.f32.mrb[4].mxu0  ;;  %v562_v39 = vadd.f32 %v561_v33, %v444_v36  ;;  %379 = vst.msk [vmem:[#allocation5] sm:$0x1] %vm378_vm4, %v1277_v34 }
 0x13c   : > { %v567_v40 = vpop.f32.mrb[5].mxu0 }
 0x13d   : > { %v569_v41 = vpop.f32.mrb[6].mxu0  ;;  %1140 = vtanh.f32 %v560_v37 }
 0x13e   : > { %v449_v42 = vpop.permute.xlu1 %448  ;;  %v571_v43 = vpop.f32.mrb[7].mxu0  ;;  %1142 = vtanh.f32 %v562_v39 }
 0x13f   : > { %v566_v44 = vadd.f32 %v565_v38, %v449_v42  ;;  %v568_v45 = vadd.f32 %v567_v40, %v449_v42  ;;  %v647_v40 = vsub.s32 0, %v646_v22 }
 0x141   : > { %1144 = vtanh.f32 %v566_v44 }
 0x142   : > { %v454_v46 = vpop.permute.xlu1 %453  ;;  %1146 = vtanh.f32 %v568_v45 }
 0x143   : > { %v570_v47 = vadd.f32 %v569_v41, %v454_v46  ;;  %v572_v48 = vadd.f32 %v571_v43, %v454_v46  ;;  %v1137_v50 = vpop.eup %1136 }
 0x144   : > { %v1139_v51 = vpop.eup %1138 }
 0x145   : > { %1148 = vtanh.f32 %v570_v47 }
 0x146   : > { %v589_v49 = vpop.permute.xlu1 %588  ;;  %1150 = vtanh.f32 %v572_v48 }
 0x147   : > { %v1141_v52 = vpop.eup %1140  ;;  %v606_v55 = vmul.f32 %v1137_v50, %v589_v49  ;;  %v607_v56 = vmul.f32 %v1139_v51, %v589_v49 }
 0x148   : > { %v1143_v53 = vpop.eup %1142 }
 0x14a   : > { %v594_v54 = vpop.permute.xlu1 %593 }
 0x14b   : > { %v608_v57 = vmul.f32 %v1141_v52, %v594_v54  ;;  %v609_v58 = vmul.f32 %v1143_v53, %v594_v54  ;;  %v1145_v59 = vpop.eup %1144  ;;  %v655_v52 = vld [vmem:[#allocation4] sm:$0x1] }
 0x14c   : > { %v1147_v62 = vpop.eup %1146 }
 0x14d   : > { %v614_v60 = vadd.f32 %v608_v57, %v606_v55  ;;  %v623_v61 = vadd.f32 %v609_v58, %v607_v56 }
 0x14e   : > { %v599_v63 = vpop.permute.xlu1 %598 }
 0x14f   : > { %v610_v1 = vmul.f32 %v1145_v59, %v599_v63  ;;  %v611_v2 = vmul.f32 %v1147_v62, %v599_v63  ;;  %v1149_v3 = vpop.eup %1148 }
 0x150   : > { %v1151_v6 = vpop.eup %1150 }
 0x151   : > { %v615_v4 = vadd.f32 %v614_v60, %v610_v1  ;;  %v624_v5 = vadd.f32 %v623_v61, %v611_v2  ;;  %v663_v60 = vld [vmem:[#allocation5] sm:$0x1] }
 0x152   : > { %v604_v7 = vpop.permute.xlu1 %603 }
 0x153   : > { %v612_v8 = vmul.f32 %v1149_v3, %v604_v7  ;;  %v613_v9 = vmul.f32 %v1151_v6, %v604_v7 }
 0x155   : > { %v616_v10 = vadd.f32 %v615_v4, %v612_v8  ;;  %v625_v11 = vadd.f32 %v624_v5, %v613_v9 }
 0x157   : > { %v617_v12 = vrot.slane %v616_v10, 4  ;;  %v626_v13 = vrot.slane %v625_v11, 4 }
 0x159   : > { %v618_v0 = vadd.f32 %v617_v12, %v616_v10  ;;  %v627_v14 = vadd.f32 %v626_v13, %v625_v11 }
 0x15b   : > { %v619_v18 = vrot.slane %v618_v0, 2  ;;  %v628_v19 = vrot.slane %v627_v14, 2 }
 0x15d   : > { %v620_v20 = vadd.f32 %v619_v18, %v618_v0  ;;  %v629_v21 = vadd.f32 %v628_v19, %v627_v14 }
 0x15f   : > { %v621_v24 = vrot.slane %v620_v20, 1  ;;  %v630_v25 = vrot.slane %v629_v21, 1 }
 0x161   : > { %v622_v26 = vadd.f32 %v621_v24, %v620_v20  ;;  %v631_v27 = vadd.f32 %v630_v25, %v629_v21 }
 0x163   : > { %v633_v29 = vmax.f32 %v622_v26, %v631_v27  ;;  %v751_v30 = vcombine.low %v622_v26, %v631_v27 }
 0x165   : > { %634 = vmax.xlane.f32.xlu1 %v633_v29  ;;  %v758_v31 = vrot.slane %v751_v30, %v757_v28 }
 0x167   : > { %v765_v33 = vrot.slane %v758_v31, %v757_v28 }
 0x169   : > { %774 = vst.msk [vmem:[%s1496_s12] sm:$0x3] %vm1492_vm3, %v765_v33 }
 0x170   : > { %v781_v5 = vld [vmem:[%s1496_s12] sm:$0x3] }
 0x1f2   : > { %v635_v36 = vpop.xlane.xlu1 %634 }
 0x1f3   : > { %v636_v37 = vmax.f32 %v632_v35, %v635_v36 }
 0x1f5   : > { %v637_v38 = vsub.f32 %v632_v35, %v636_v37  ;;  %747 = vst.msk [vmem:[#allocation3] sm:$0x1] %vm375_vm2, %v636_v37  ;;  %642 = vperm.xlu0 %1132, %v636_v37  }
 0x1f7   : > { %v638_v50 = vmul.f32 1.442695, %v637_v38 }
 0x1fc   : > { %v782_v39 = vld [vmem:[#allocation3] sm:$0x1] }
 0x1fd   : > { %785 = vperm.xlu1 %1133, %v782_v39  }
 0x274   : > { %v643_v41 = vpop.permute.xlu0 %642 }
 0x275   : > { %v648_v42 = vrot.slane %v643_v41, %v647_v40 }
 0x277   : > { %v649_v43 = vsub.f32 %v622_v26, %v648_v42  ;;  %v650_v44 = vsub.f32 %v631_v27, %v648_v42 }
 0x279   : > { %v651_v45 = vmul.f32 1.442695, %v649_v43  ;;  %v653_v46 = vmul.f32 1.442695, %v650_v44 }
 0x27b   : > { %1152 = vpow2.f32 %v651_v45 }
 0x27c   : > { %1154 = vpow2.f32 %v653_v46  ;;  %v786_v3 = vpop.permute.xlu1 %785 }
 0x27d   : > { %1156 = vpow2.f32 %v638_v50  ;;  %v791_v4 = vrot.slane %v786_v3, %v647_v40 }
 0x27f   : > { %v792_v6 = vsub.f32 %v781_v5, %v791_v4 }
 0x281   : > { %v793_v7 = vmul.f32 1.442695, %v792_v6 }
 0x285   : > { %v1153_v47 = vpop.eup %1152 }
 0x286   : > { %v1155_v48 = vpop.eup %1154 }
 0x287   : > { %738 = vmatprep.mubr.f32.mxu1 %v1155_v48  ;;  %v657_v49 = vadd.f32 %v1155_v48, %v1153_v47  ;;  %v1157_v51 = vpop.eup %1156 }
 0x288   : > { %739 = vmatmul.mubr.f32.vlgmr.msra.gmra.mrb[0].mxu1 %v1153_v47  ;;  %v656_v53 = vmul.f32 %v1157_v51, %v655_v52 }
 0x289   : > { %658 = vadd.xlane.f32.xlu0 %v657_v49 }
 0x29f   : > { %666 = vperm.xlu0 %1132, %v1157_v51  }
 0x316   : > { %v659_v54 = vpop.xlane.xlu0 %658 }
 0x317   : > { %v660_v55 = vadd.f32 %v659_v54, %v656_v53 }
 0x319   : > { %662 = vst.msk [vmem:[#allocation4] sm:$0x1] %vm375_vm2, %v660_v55 }
 0x31e   : > { %v667_v58 = vpop.permute.xlu0 %666 }
 0x31f   : > { %v672_v59 = vrot.slane %v667_v58, %v647_v40 }
 0x320   : > { %v778_v56 = vld [vmem:[#allocation4] sm:$0x1] }
 0x321   : > { %1158 = vrcp.f32 %v778_v56  ;;  %v673_v63 = vmul.f32 %v672_v59, %v663_v60 }
 0x322   : > { %1160 = vpow2.f32 %v793_v7 }
 0x32b   : > { %v1159_v57 = vpop.eup %1158 }
 0x32c   : > { %797 = vperm.xlu1 %1133, %v1159_v57   ;;  %v1161_v10 = vpop.eup %1160 }
 0x35b   : > { %v1025_v61 = vpop.f32.mrb[0].mxu1 }
 0x35c   : > { %v1026_v62 = vpop.f32.mrb[1].mxu1 }
 0x35d   : > { %v1027_v1 = vadd.f32 %v1026_v62, %v1025_v61 }
 0x35f   : > { %v744_v2 = vadd.f32 %v1027_v1, %v673_v63 }
 0x361   : > { %746 = vst.msk [vmem:[#allocation5] sm:$0x1] %vm378_vm4, %v744_v2 }
 0x368   : > { %v806_v11 = vld [vmem:[#allocation5] sm:$0x1] }
 0x3ab   : > { %v798_v8 = vpop.permute.xlu1 %797 }
 0x3ac   : > { %v803_v9 = vrot.slane %v798_v8, %v647_v40 }
 0x3ae   : > { %v804_v12 = vmul.f32 %v1161_v10, %v803_v9  ;;  %v807_v13 = vmul.f32 %v806_v11, %v803_v9 }
 0x3b0   : > { %805 = vst.msk [vmem:[%s1496_s12] sm:$0x3] %vm1492_vm3, %v804_v12 }
 0x3b1   : > { %808 = vst.msk [vmem:[%s315_s19] sm:$0x1] %vm378_vm4, %v807_v13 }
 0x3b2   : > { %1175 = shalt.err (!%p1172_p5)
}
 0x3b3   : > { %s1176_s12 = scalar_lea.hbm %s1514_s22, 32  ;;  %s1180_s30 = scalar_lea.hbm %s1601_s6, 64 }
 0x3b4   : > { %p1177_p6 = scmp.ne.s32.totalorder %s1514_s22, %s1176_s12  ;;  %p1181_p10 = scmp.lt.u32.totalorder %s1514_s22, %s1601_s6 }
 0x3b5   : > { %p1182_p11 = scmp.lt.u32.totalorder %s1180_s30, %s1176_s12  ;;  %p1184_p13 = scmp.lt.u32.totalorder %s1176_s12, %s1514_s22 }
 0x3b6   : > { %p1178_p7 = pnand %p1177_p6, %p1360_p4 }
 0x3b7   : > { %p1183_p12 = por %p1182_p11, %p1181_p10 }
 0x3b8   : > { %p1179_p9 = pneg %p1178_p7 }
 0x3b9   : > { %p1185_p0 = por %p1184_p13, %p1183_p12 }
 0x3bb   : > { %p1186_p1 = pnand %p1185_p0, %p1179_p9 }
 0x3bd   : > { %1189 = shalt.err (!%p1186_p1)
}
 0x3be   : > { %1068 = dma.vmem_to_hbm [thread:$0]  (%p1360_p4), %s1516_s17, 32, %s1514_s22, %s810_s10  }
 0x3bf   : > { %s815_s16 = scalar_lea.sflag [#allocation9], %s1489_s8  ;;  %s1190_s23 = scalar_lea.vmem %s1523_s20, 16 }
 0x3c0   : > { %p1191_p2 = scmp.ne.s32.totalorder %s1523_s20, %s1190_s23  ;;  %s1279_s12 = smov [#allocation8]  }
 0x3c1   : > { %s1194_s18 = sshll.u32 %s1279_s12, 4  ;;  %s1195_s18 = int_to_ptr.vmem [resolvable:$false] %s1194_s18 }
 0x3c2   : > { %p1192_p3 = pnand %p1191_p2, %p1360_p4  ;;  %s1196_s19 = scalar_lea.vmem %s1195_s18, 32 }
 0x3c3   : > { %p1197_p6 = scmp.lt.s32.totalorder %s1523_s20, %s1195_s18  ;;  %p1198_p7 = scmp.lt.s32.totalorder %s1196_s19, %s1190_s23 }
 0x3c4   : > { %p1193_p5 = pneg %p1192_p3 }
 0x3c5   : > { %p1199_p9 = por %p1198_p7, %p1197_p6 }
 0x3c7   : > { %p1200_p10 = pnand %p1199_p9, %p1193_p5 }
 0x3c9   : > { %1203 = shalt.err (!%p1200_p10)
}
 0x3ca   : > { %s1204_s8 = scalar_lea.hbm %s1521_s27, 16  ;;  %s1208_s10 = scalar_lea.hbm %s1602_s7, 32 }
 0x3cb   : > { %p1205_p11 = scmp.ne.s32.totalorder %s1521_s27, %s1204_s8  ;;  %p1209_p0 = scmp.lt.u32.totalorder %s1521_s27, %s1602_s7 }
 0x3cc   : > { %p1210_p1 = scmp.lt.u32.totalorder %s1208_s10, %s1204_s8  ;;  %p1212_p3 = scmp.lt.u32.totalorder %s1204_s8, %s1521_s27 }
 0x3cd   : > { %p1206_p12 = pnand %p1205_p11, %p1360_p4 }
 0x3ce   : > { %p1211_p2 = por %p1210_p1, %p1209_p0 }
 0x3cf   : > { %p1207_p13 = pneg %p1206_p12 }
 0x3d0   : > { %p1213_p5 = por %p1212_p3, %p1211_p2 }
 0x3d2   : > { %p1214_p6 = pnand %p1213_p5, %p1207_p13 }
 0x3d4   : > { %1217 = shalt.err (!%p1214_p6)
}
 0x3d5   : > { %1069 = dma.vmem_to_hbm [thread:$0]  (%p1360_p4), %s1523_s20, 16, %s1521_s27, %s815_s16  }
 0x3d6 PF: > { %p1079_p7 = scmp.ge.s32.totalorder %s1272_s29, 2  ;;  %s853_s21 = sand.u32 1, %s1252_s24  }
 0x3d7   : > { %s854_s23 = scalar_lea.sflag [#allocation7], %s853_s21 }
 0x3d8   : > { %p1073_p9 = pnand %p1079_p7, %p1367_p8 }
 0x3da   : > { %1243 = dma.done.wait (!%p1073_p9), %s854_s23, 32  }
 0x3db   : > { %1245 = vsyncadd (!%p1073_p9), %s854_s23, 4294967264  ;;  %s863_s12 = scalar_lea.sflag [#allocation9], %s853_s21 }
 0x3dc   : > { %1247 = dma.done.wait (!%p1073_p9), %s863_s12, 16  }
 0x3dd   : > { %1249 = vsyncadd (!%p1073_p9), %s863_s12, 4294967280  ;;  %s24_s29 = sadd.s32 1, %s1272_s29   ;;  %s1607_s24 = smov %s1256_s25 }
 0x3de   : > { %p21_p10 = scmp.ge.s32.totalorder %s24_s29, 4   ;;  %s1608_s25 = smov %s1260_s26 }
 0x3df   : > { %s1609_s26 = smov %s1373_s14  ;;  %s1610_s27 = smov %s1268_s28 }
 0x3e0   : > { %s1611_s28 = smov %s1613_s9  ;;  %23 = sbr.rel (!%p21_p10) target bundleno = 6 (0x6), region = 108 }
 0x3e7   :  { %867 = vsyncpa [#allocation7], 1 }
 0x3e8   :  { %869 = vsyncpa [#allocation7 + $0x1], 1 }
 0x3e9   :  { %870 = vsyncpa [#allocation9], 1 }
 0x3ea   :  { %872 = vsyncpa [#allocation9 + $0x1], 1 }

</bundles_post_ra>
